<compile_context>
chip_gen: v5e
topology: v5e:2x2
jax: 0.10.0
libtpu: 0.0.40
codegen_flags: <defaults>
</compile_context>

<pallas_src>
import math

import jax
import jax.numpy as jnp
from jax.experimental import pallas as pl
from jax.experimental.pallas import tpu as pltpu

_LANE = 128      # TPU lane width (last-dim granularity)
_SUBLANE = 8     # TPU sublane width for 32-bit dtypes


def _round_up(x, m):
    return ((x + m - 1) // m) * m


def _row_align(dtype):
    # Sublane packing: 32-bit -> 8 rows, 16-bit -> 16 rows, 8-bit -> 32 rows.
    return _SUBLANE * max(1, 4 // jnp.dtype(dtype).itemsize)


def _choose_row_tile(n, block_rows, dtype):
    align = _row_align(dtype)
    # Correctness: the row tile must be a sublane multiple even if the caller
    # passes an unaligned block_rows.
    block_rows = max(align, (block_rows // align) * align)
    tm = min(block_rows, _round_up(n, align))
    # Guarantee >= 2 row steps when possible so (a) the BlockSpec pipeline has
    # something to overlap and (b) v7x's second TensorCore gets work via the
    # "parallel" row axis (v5e/v6e have a single TC and are unaffected).
    if pl.cdiv(n, tm) < 2 and n > align:
        tm = _round_up(pl.cdiv(n, 2), align)
    return tm


def _choose_col_tile(in_rows, out_pad, w_itemsize, budget_bytes):
    """Column (OUT) tile for the weight.  Fully resident when it fits the
    budget (important for v7x's 64 MiB VMEM); otherwise tiled in lane
    multiples and streamed (double-buffered)."""
    if in_rows * out_pad * w_itemsize <= budget_bytes:
        return out_pad
    tn = (budget_bytes // (2 * in_rows * w_itemsize)) // _LANE * _LANE
    return int(min(max(tn, _LANE), out_pad))


def _vmem_limit_bytes(footprint_bytes):
    """Derive vmem_limit_bytes from the actual footprint (with headroom),
    clamped to the current generation's VMEM capacity."""
    limit = int(footprint_bytes * 1.5) + (8 << 20)
    limit = max(limit, 32 << 20)
    try:
        cap = int(pltpu.get_tpu_info().vmem_capacity_bytes)
    except Exception:
        cap = 64 << 20                     # conservative (v7x-sized) fallback
    return int(min(limit, max(cap - (8 << 20), 16 << 20)))


def _resident_spec(shape, index_map):
    """BlockSpec for a grid-invariant operand: single-buffered to halve its
    VMEM footprint (falls back to default double-buffering if this JAX
    version does not accept pipeline_mode)."""
    try:
        return pl.BlockSpec(shape, index_map, pipeline_mode=pl.Buffered(1))
    except TypeError:
        return pl.BlockSpec(shape, index_map)


# ---------------------------------------------------------------------------
# Parameter preparation (one-time, not per forward call)
# ---------------------------------------------------------------------------

def prepare_sine_layer_params(weight, bias, omega, *, param_dtype=jnp.float32,
                              in_pad_to=None, lane_multiple=_LANE):
    """Fold omega, transpose, and zero-pad one SineLayer's parameters.

    weight: (OUT, IN) float32 (PyTorch nn.Linear layout); bias: (OUT,) or None.
      * OUT is padded to `lane_multiple` (use 256 on v6e/v7x for compute-bound
        layers to fill the 256-wide MXU; 128 otherwise).
      * IN is padded to `in_pad_to` (previous layer's padded OUT) so layers
        chain on the padded width with no per-layer slice.
    Weights may be stored in bf16 (HBM-bandwidth win); bias stays f32 so the
    bias add + sin happen in f32.
    Returns (w_prepared (IN_pad, OUT_pad), b_prepared (1, OUT_pad) f32, out_features).
    """
    out_f, in_f = weight.shape
    if bias is None:
        bias = jnp.zeros((out_f,), jnp.float32)
    out_pad = _round_up(out_f, lane_multiple)
    in_pad = in_f if in_pad_to is None else int(in_pad_to)
    assert in_pad >= in_f
    w = (omega * weight.astype(jnp.float32)).T                      # (IN, OUT)
    w = jnp.pad(w, ((0, in_pad - in_f), (0, out_pad - out_f)))      # (IN_pad, OUT_pad)
    b = jnp.pad(omega * bias.astype(jnp.float32), (0, out_pad - out_f))
    return w.astype(param_dtype), b.reshape(1, out_pad).astype(jnp.float32), out_f


def prepare_siren_mlp_params(layers, omega, *, param_dtype=jnp.float32,
                             lane_multiple=_LANE):
    """Prepare a stack of SineLayer params for the fused MLP kernel.  Each
    layer's IN axis is padded to the previous layer's padded OUT width."""
    omegas = list(omega) if isinstance(omega, (list, tuple)) else [omega] * len(layers)
    prepared = []
    in_pad_to = None
    for (weight, bias), om in zip(layers, omegas):
        w_p, b_p, out_f = prepare_sine_layer_params(
            weight, bias, om, param_dtype=param_dtype,
            in_pad_to=in_pad_to, lane_multiple=lane_multiple)
        prepared.append((w_p, b_p, out_f))
        in_pad_to = w_p.shape[1]
    return prepared


# ---------------------------------------------------------------------------
# Kernels
# ---------------------------------------------------------------------------

def _sine_layer_kernel(x_ref, w_ref, b_ref, o_ref):
    # MXU matmul (f32 accumulate) + f32 bias add (VPU) + sin (EUP).
    # TODO(synk): on v5e, dump the lowering (pl.lower_as_mlir) to confirm
    # jnp.sin stays a single EUP op rather than a VPU polynomial expansion.
    z = jnp.dot(x_ref[...].astype(w_ref.dtype), w_ref[...],
                preferred_element_type=jnp.float32)
    o_ref[...] = jnp.sin(z + b_ref[...]).astype(o_ref.dtype)


def _make_fused_siren_kernel(num_layers):
    def kernel(*refs):
        x_ref, o_ref = refs[0], refs[-1]
        act = x_ref[...]
        for layer in range(num_layers):
            w_ref = refs[1 + 2 * layer]
            b_ref = refs[2 + 2 * layer]
            z = jnp.dot(act.astype(w_ref.dtype), w_ref[...],
                        preferred_element_type=jnp.float32)
            act = jnp.sin(z + b_ref[...])          # stays f32, stays in VMEM
        o_ref[...] = act.astype(o_ref.dtype)
    return kernel


# ---------------------------------------------------------------------------
# Forward wrappers
# ---------------------------------------------------------------------------

def sine_layer_forward(x, w_prepared, b_prepared, out_features=None, *,
                       block_rows=1024, trim_output=True, out_dtype=jnp.float32,
                       resident_weight_budget=20 << 20):
    """Single SineLayer forward: sin(x @ w_prepared + b_prepared).

    Pass trim_output=False when chaining layers so the lane-padded width flows
    through (no extra HBM slice-copy per layer); slice only at the very end.
    """
    n, in_f = x.shape
    in_w, out_pad = w_prepared.shape
    assert in_w == in_f, (in_w, in_f)
    assert out_pad % _LANE == 0

    x_item = jnp.dtype(x.dtype).itemsize
    w_item = jnp.dtype(w_prepared.dtype).itemsize
    o_item = jnp.dtype(out_dtype).itemsize

    tm = _choose_row_tile(n, block_rows, x.dtype)
    tn = _choose_col_tile(in_f, out_pad, w_item, resident_weight_budget)
    w_resident = tn == out_pad
    grid = (pl.cdiv(n, tm), pl.cdiv(out_pad, tn))

    w_buffers = 1 if w_resident else 2
    footprint = (2 * tm * in_f * x_item            # x tile, double-buffered
                 + 2 * tm * tn * o_item            # out tile, double-buffered
                 + w_buffers * in_f * tn * w_item  # weight (resident or streamed)
                 + w_buffers * tn * 4)             # bias

    if w_resident:
        w_spec = _resident_spec((in_f, tn), lambda i, j: (0, j))
        b_spec = _resident_spec((1, tn), lambda i, j: (0, j))
    else:
        w_spec = pl.BlockSpec((in_f, tn), lambda i, j: (0, j))
        b_spec = pl.BlockSpec((1, tn), lambda i, j: (0, j))

    cost = pl.CostEstimate(
        flops=2 * n * in_f * out_pad,
        transcendentals=n * out_pad,
        bytes_accessed=(n * in_f * x_item + in_f * out_pad * w_item
                        + n * out_pad * o_item),
    )

    y = pl.pallas_call(
        _sine_layer_kernel,
        out_shape=jax.ShapeDtypeStruct((n, out_pad), out_dtype),
        grid=grid,
        in_specs=[
            pl.BlockSpec((tm, in_f), lambda i, j: (i, 0)),   # x rows stream
            w_spec,
            b_spec,
        ],
        out_specs=pl.BlockSpec((tm, tn), lambda i, j: (i, j)),
        compiler_params=pltpu.CompilerParams(
            dimension_semantics=("parallel", "parallel"),
            vmem_limit_bytes=_vmem_limit_bytes(footprint),
        ),
        cost_estimate=cost,
    )(x, w_prepared, b_prepared)

    if out_features is None:
        out_features = out_pad
    if trim_output and out_features != out_pad:
        y = y[:, :out_features]
    return y


def siren_mlp_forward(x, layer_params, *, block_rows=1024, trim_output=True,
                      out_dtype=jnp.float32, resident_weight_budget=24 << 20):
    """Fused multi-layer SIREN forward in ONE pallas_call: stream a row tile
    of x, keep every prepared W'/b' resident in VMEM (single-buffered), chain
    dot -> +b -> sin per layer on the VMEM activation tile, write only the
    final layer's activations (no intermediate activation HBM traffic)."""
    n, in_f = x.shape
    num_layers = len(layer_params)
    assert num_layers >= 1
    assert layer_params[0][0].shape[0] == in_f

    weight_bytes = sum(w.size * jnp.dtype(w.dtype).itemsize
                       + b.size * jnp.dtype(b.dtype).itemsize
                       for w, b, _ in layer_params)
    if weight_bytes > resident_weight_budget:
        # Weight stack too large for resident VMEM (e.g. very wide layers on
        # v7x's 64 MiB): fall back to per-layer kernels, keeping the padded
        # width (and bf16 activations, if used) flowing between layers.
        # TODO(synk): replace this fallback with in-kernel double-buffered
        # weight DMA so activations still stay in VMEM across layers.
        act = x
        for idx, (w_p, b_p, out_f) in enumerate(layer_params):
            last = idx == num_layers - 1
            act = sine_layer_forward(
                act, w_p, b_p, out_f, block_rows=block_rows,
                trim_output=(trim_output and last),
                out_dtype=out_dtype if last else w_p.dtype)
        return act

    out_pad = layer_params[-1][0].shape[1]
    out_f_last = layer_params[-1][2]
    tm = _choose_row_tile(n, block_rows, x.dtype)
    grid = (pl.cdiv(n, tm),)

    x_item = jnp.dtype(x.dtype).itemsize
    o_item = jnp.dtype(out_dtype).itemsize
    act_bytes = sum(tm * w.shape[1] * 4 for w, _, _ in layer_params)
    footprint = (2 * tm * in_f * x_item + 2 * tm * out_pad * o_item
                 + weight_bytes + act_bytes)

    in_specs = [pl.BlockSpec((tm, in_f), lambda i: (i, 0))]
    args = [x]
    flops = 0
    transcendentals = 0
    for w_p, b_p, _ in layer_params:
        wi, wo = w_p.shape
        in_specs.append(_resident_spec((wi, wo), lambda i: (0, 0)))
        in_specs.append(_resident_spec((1, wo), lambda i: (0, 0)))
        args += [w_p, b_p]
        flops += 2 * n * wi * wo
        transcendentals += n * wo

    cost = pl.CostEstimate(
        flops=flops, transcendentals=transcendentals,
        bytes_accessed=n * in_f * x_item + weight_bytes + n * out_pad * o_item)

    y = pl.pallas_call(
        _make_fused_siren_kernel(num_layers),
        out_shape=jax.ShapeDtypeStruct((n, out_pad), out_dtype),
        grid=grid,
        in_specs=in_specs,
        out_specs=pl.BlockSpec((tm, out_pad), lambda i: (i, 0)),
        compiler_params=pltpu.CompilerParams(
            dimension_semantics=("parallel",),
            vmem_limit_bytes=_vmem_limit_bytes(footprint),
        ),
        cost_estimate=cost,
    )(*args)

    if trim_output and out_f_last != out_pad:
        y = y[:, :out_f_last]
    return y


# ---------------------------------------------------------------------------
# Initialization helpers (match the PyTorch module)
# ---------------------------------------------------------------------------

def original_siren_initialization(key, out_features, in_features, is_first, omega):
    if is_first:
        bound = 1.0 / in_features
    else:
        bound = math.sqrt(6.0 / in_features) / omega
    return jax.random.uniform(key, (out_features, in_features), jnp.float32,
                              minval=-bound, maxval=bound)


def default_linear_bias_init(key, out_features, in_features):
    bound = 1.0 / math.sqrt(in_features)
    return jax.random.uniform(key, (out_features,), jnp.float32,
                              minval=-bound, maxval=bound)


if __name__ == "__main__":
    N, IN_F, OUT_F, HID = 64, 32, 32, 64
    OMEGA = 30

    key = jax.random.PRNGKey(0)
    k_x, k_w0, k_b0, k_w1, k_b1, k_w2, k_b2 = jax.random.split(key, 7)

    x = jax.random.normal(k_x, (N, IN_F), dtype=jnp.float32)
    w0 = original_siren_initialization(k_w0, OUT_F, IN_F, True, OMEGA)
    b0 = default_linear_bias_init(k_b0, OUT_F, IN_F)

    # ---- single SineLayer, f32 params ----
    w_p, b_p, out_f = prepare_sine_layer_params(w0, b0, OMEGA)
    y = sine_layer_forward(x, w_p, b_p, out_f)
    jax.block_until_ready(y)
    y_ref = jnp.sin(OMEGA * (x @ w0.T + b0))
    assert y.shape == (N, OUT_F)
    assert jnp.allclose(y, y_ref, atol=1e-4, rtol=1e-4)

    # ---- single SineLayer, bf16 x/W (f32 accumulate, bias add, sin) ----
    w_p16, b_p16, _ = prepare_sine_layer_params(w0, b0, OMEGA,
                                                param_dtype=jnp.bfloat16)
    y16 = sine_layer_forward(x.astype(jnp.bfloat16), w_p16, b_p16, out_f)
    jax.block_until_ready(y16)
    assert y16.shape == (N, OUT_F)
    assert jnp.allclose(y16.astype(jnp.float32), y_ref, atol=1e-1, rtol=0.0)

    # ---- fused 3-layer SIREN MLP (activations never leave VMEM) ----
    w1 = original_siren_initialization(k_w1, HID, OUT_F, False, OMEGA)
    b1 = default_linear_bias_init(k_b1, HID, OUT_F)
    w2 = original_siren_initialization(k_w2, OUT_F, HID, False, OMEGA)
    b2 = default_linear_bias_init(k_b2, OUT_F, HID)

    layers_raw = [(w0, b0), (w1, b1), (w2, b2)]
    layer_params = prepare_siren_mlp_params(layers_raw, OMEGA)
    y_mlp = siren_mlp_forward(x, layer_params)
    jax.block_until_ready(y_mlp)

    a_ref = x
    for w, b in layers_raw:
        a_ref = jnp.sin(OMEGA * (a_ref @ w.T + b))
    assert y_mlp.shape == a_ref.shape
    assert jnp.allclose(y_mlp, a_ref, atol=5e-4, rtol=5e-4)

    print("KERNEL_OK")
</pallas_src>

<mosaic_0001>
module attributes {stable_mosaic.version = 11 : i64} {
  func.func @_sine_layer_kernel(%arg0: i32, %arg1: i32, %arg2: memref<32x32xf32, #tpu.memory_space<vmem>>, %arg3: memref<32x128xf32, #tpu.memory_space<vmem>>, %arg4: memref<1x128xf32, #tpu.memory_space<vmem>>, %arg5: memref<32x128xf32, #tpu.memory_space<vmem>>) attributes {dimension_semantics = [#tpu.dimension_semantics<parallel>, #tpu.dimension_semantics<parallel>], iteration_bounds = array<i64: 2, 1>, scalar_prefetch = 0 : i64, scratch_operands = 0 : i64, tpu.core_type = #tpu.core_type<tc>, window_params = [{transform_indices = @transform_0, window_bounds = array<i64: 32, 32>}, {pipeline_mode = #tpu.pipeline_mode<synchronous>, transform_indices = @transform_1, window_bounds = array<i64: 32, 128>}, {pipeline_mode = #tpu.pipeline_mode<synchronous>, transform_indices = @transform_2, window_bounds = array<i64: 1, 128>}, {transform_indices = @transform_3, window_bounds = array<i64: 32, 128>}]} {
    %c0 = arith.constant 0 : index
    %c0_0 = arith.constant 0 : index
    %0 = vector.load %arg2[%c0, %c0_0] : memref<32x32xf32, #tpu.memory_space<vmem>>, vector<32x32xf32>
    %c0_1 = arith.constant 0 : index
    %c0_2 = arith.constant 0 : index
    %1 = vector.load %arg3[%c0_1, %c0_2] : memref<32x128xf32, #tpu.memory_space<vmem>>, vector<32x128xf32>
    %cst = arith.constant dense<0.000000e+00> : vector<32x128xf32>
    %2 = tpu.matmul %0, %1, %cst {dimension_numbers = #tpu.dot_dimension_numbers<[1], [0], [0], [1], [0, 0, 1, 1], [], []>} : vector<32x32xf32>, vector<32x128xf32>, vector<32x128xf32> -> vector<32x128xf32>
    %c0_3 = arith.constant 0 : index
    %c0_4 = arith.constant 0 : index
    %3 = vector.load %arg4[%c0_3, %c0_4] : memref<1x128xf32, #tpu.memory_space<vmem>>, vector<1x128xf32>
    %4 = vector.broadcast %3 : vector<1x128xf32> to vector<32x128xf32>
    %5 = arith.addf %2, %4 : vector<32x128xf32>
    %6 = math.sin %5 : vector<32x128xf32>
    %c0_5 = arith.constant 0 : index
    %c0_6 = arith.constant 0 : index
    %7 = vector.load %arg5[%c0_5, %c0_6] : memref<32x128xf32, #tpu.memory_space<vmem>>, vector<32x128xf32>
    tpu.vector_store %arg5[%c0_5, %c0_6], %6 {strides = array<i32>} : memref<32x128xf32, #tpu.memory_space<vmem>>, vector<32x128xf32>,
    return
  }
  func.func @transform_0(%arg0: i32, %arg1: i32) -> (i32, i32) {
    %c0_i32 = arith.constant 0 : i32
    %c0_i32_0 = arith.constant 0 : i32
    return %arg0, %c0_i32 : i32, i32
  }
  func.func @transform_1(%arg0: i32, %arg1: i32) -> (i32, i32) {
    %c0_i32 = arith.constant 0 : i32
    %c0_i32_0 = arith.constant 0 : i32
    return %c0_i32, %arg1 : i32, i32
  }
  func.func @transform_2(%arg0: i32, %arg1: i32) -> (i32, i32) {
    %c0_i32 = arith.constant 0 : i32
    %c0_i32_0 = arith.constant 0 : i32
    return %c0_i32, %arg1 : i32, i32
  }
  func.func @transform_3(%arg0: i32, %arg1: i32) -> (i32, i32) {
    %c0_i32 = arith.constant 0 : i32
    return %arg0, %arg1 : i32, i32
  }
}

</mosaic_0001>

<bundles_post_ra>
// kernel: tpu_custom_call.1
= control target key start
LH: loop header
LB: loop body
LE: loop exit
PB: predicated region body
PF: predicated region fallthrough
CT: control target
= control target key end

     0   :  { %8 = vsyncpa [#allocation3], 0  ;;  %s1773_s0 = inlined_call_operand.vmem [shape: f32[64,32], index: 0, kind: input, shape index: {}]   ;;  %s1774_s1 = inlined_call_operand.vmem [shape: f32[32,128], index: 1, kind: input, shape index: {}]   ;;  %s1775_s2 = inlined_call_operand.vmem [shape: f32[1,128], index: 2, kind: input, shape index: {}]   ;;  %s1776_s3 = inlined_call_operand.hbm [shape: f32[64,128], index: 3, kind: output, shape index: {}]  }
   0x1   :  { %10 = vsyncpa [#allocation3 + $0x1], 0  ;;  %s1229_s12 = smov 0   ;;  %s1231_s13 = smov 0  }
   0x2   :  { %s1233_s14 = smov 0   ;;  %s1235_s15 = smov 0  }
   0x3   :  { %s1237_s16 = smov 0   ;;  %s1239_s17 = smov 0  }
   0x4 LB: > { %s1011_s18 = sadd.s32 4294967295, %s1198_s17   ;;  %s1012_s19 = sadd.s32 4294967294, %s1198_s17   ;;  %s1198_s17 = sphi %s1239_s17, %s16_s17   ;;  %s1194_s16 = sphi %s1237_s16, %s1789_s16   ;;  %s1190_s15 = sphi %s1235_s15, %s1788_s15   ;;  %s1186_s14 = sphi %s1233_s14, %s1787_s14   ;;  %s1182_s13 = sphi %s1231_s13, %s1786_s13   ;;  %s1178_s12 = sphi %s1229_s12, %s1785_s12  }
   0x5   : > { %s28_s20 = sadd.s32 1, %s1194_s16  ;;  %s115_s21 = sadd.s32 1, %s1186_s14 }
   0x6   : > { %p30_p0 = scmp.ge.s32.totalorder %s28_s20, 2  ;;  %p125_p1 = scmp.ne.s32.totalorder %s1186_s14, %s1182_s13 }
   0x7   : > { %p126_p2 = scmp.eq.s32.totalorder %s1011_s18, 1  ;;  %p131_p3 = scmp.ne.s32.totalorder %s1182_s13, %s1178_s12 }
   0x8   : > { %s1791_s20 = smov (%p30_p0, %s28_s20), 0  ;;  %p132_p5 = scmp.eq.s32.totalorder %s1012_s19, 1 }
   0x9   : > { %p1269_p4 = por %p126_p2, %p125_p1  ;;  %s110_s23 = ssub.s32 %s1194_s16, %s1791_s20 }
   0xa   : > { %p1017_p6 = scmp.ge.s32.totalorder %s1198_s17, 1  ;;  %p113_p7 = scmp.eq.s32.totalorder %s110_s23, 0 }
   0xb   : > { %p1276_p8 = por %p132_p5, %p131_p3  ;;  %p172_p9 = scmp.lt.s32.totalorder %s1198_s17, 3 }
   0xc   : > { %s1282_s25 = scalar_select %p113_p7, %s1186_s14, %s115_s21  }
   0xd   : > { %p173_p10 = pnand %p1017_p6, %p172_p9 }
   0xe   : > { %s1019_s30 = sshll.u32 (!%p173_p10), %s1190_s15, 2  ;;  %s200_s21 = sand.u32 (!%p173_p10), 1, %s1182_s13  }
   0xf   : > { %176 = sbr.rel (%p173_p10) target bundleno = 352 (0x160), region = 32  ;;  %p204_p11 = scmp.lt.s32.totalorder (!%p173_p10), %s1019_s30, 7 }
  0x10   : > { %s1018_s23 = sshll.u32 (!%p173_p10), %s200_s21, 5  ;;  %s1042_s27 = sshll.u32 (!%p173_p10), %s1190_s15, 5 }
  0x11   : > { %s1617_s26 = scalar_lea.vmem (!%p173_p10), [#allocation2], %s1018_s23  ;;  %s896_s15 = scalar_lea.sflag (!%p173_p10), [#allocation3], %s200_s21 }
  0x12   : > { %s909_s4 = sshll.u32 (!%p173_p10), %s1617_s26, 4  ;;  %s1140_s10 = scalar_lea.hbm (!%p173_p10), %s1776_s3, 64  ;;  %s910_s4 = int_to_ptr.vmem [resolvable:$true] %s909_s4 }
  0x14   : > { %v224_v0 = vld [vmem:[%s1774_s1 + $0x18] sm:$0xff]  ;;  %v223_v1 = vld [vmem:[%s1774_s1 + $0x10] sm:$0xff]  ;;  %v222_v2 = vld [vmem:[%s1774_s1 + $0x8] sm:$0xff]  ;;  %s1793_s30 = smov (!%p204_p11, %s1019_s30), 7  ;;  %vm229_vm0 = vcmask 261120  }
  0x15   : > { %254 = vmatpush.msra.mxu0 %v224_v0  ;;  %1043 = vmatpush.msra.mxu1 %v224_v0  ;;  %v221_v3 = vld [vmem:[%s1774_s1] sm:$0xff]  ;;  %s1020_s8 = sshll.u32 %s1793_s30, 3  ;;  %v1200_v36 = vmov 683565275   ;;  %v1201_v38 = vmov 2475754826   ;;  %s908_s30 = scalar_lea.hbm %s1776_s3, %s1042_s27 }
  0x16   : > { %1044 = vmatpush.msra.mxu2 %v224_v0  ;;  %1045 = vmatpush.msra.mxu3 %v224_v0  ;;  %s207_s11 = scalar_lea.vmem %s1773_s0, %s1020_s8  ;;  %v1303_v8 = vld [vmem:[%s1775_s2] ss:$0 sm:$0xff]  ;;  %v1202_v40 = vmov 2131351028   ;;  %v1203_v42 = vmov 2102212464  }
  0x17   : > { %255 = vmatpush.msra.mxu0 %v223_v1  ;;  %1046 = vmatpush.msra.mxu1 %v223_v1  ;;  %v217_v4 = vld [vmem:[%s207_s11] sm:$0xff]  ;;  %v218_v5 = vld [vmem:[%s207_s11 + $0x8] sm:$0xff]  ;;  %v219_v6 = vld [vmem:[%s207_s11 + $0x10] sm:$0xff]  ;;  %v1204_v44 = vmov 920167782   ;;  %s911_s5 = sshll.u32 %s908_s30, 4  ;;  %s912_s5 = int_to_ptr.hbm [resolvable:$true] %s911_s5 }
  0x18   : > { %1047 = vmatpush.msra.mxu2 %v223_v1  ;;  %1048 = vmatpush.msra.mxu3 %v223_v1  ;;  %v220_v7 = vld [vmem:[%s207_s11 + $0x18] sm:$0xff]  ;;  %v1205_v53 = vmov 1326507024   ;;  %s1134_s6 = sshra.s32 %s912_s5, 4  ;;  %s1135_s6 = int_to_ptr.hbm [resolvable:$true] %s1134_s6 }
  0x19   : > { %256 = vmatpush.msra.mxu0 %v222_v2  ;;  %1049 = vmatpush.msra.mxu1 %v222_v2  ;;  %s1136_s7 = scalar_lea.hbm %s1135_s6, 32  ;;  %p1141_p1 = scmp.lt.s32.totalorder %s1135_s6, %s1776_s3 }
  0x1a   : > { %1050 = vmatpush.msra.mxu2 %v222_v2  ;;  %1051 = vmatpush.msra.mxu3 %v222_v2  ;;  %p1137_p12 = scmp.ne.s32.totalorder %s1135_s6, %s1136_s7  ;;  %p1142_p2 = scmp.lt.s32.totalorder %s1140_s10, %s1136_s7 }
  0x1b   : > { %257 = vmatpush.msra.mxu0 %v221_v3  ;;  %1052 = vmatpush.msra.mxu1 %v221_v3 }
  0x1c   : > { %1053 = vmatpush.msra.mxu2 %v221_v3  ;;  %1054 = vmatpush.msra.mxu3 %v221_v3  ;;  %p1138_p13 = pnand %p1137_p12, %p1269_p4  ;;  %p1143_p3 = por %p1142_p2, %p1141_p1 }
  0x1d   : > { %1021 = vmatmul.msk.f32.vlgmr.msra.gmra.mxu0 %vm229_vm0, %v217_v4  ;;  %1022 = vmatmul.msk.f32.vlgmr.msra.gmra.mxu1 %vm229_vm0, %v218_v5 }
  0x1e   : > { %1023 = vmatmul.msk.f32.vlgmr.msra.gmra.mxu2 %vm229_vm0, %v219_v6  ;;  %1024 = vmatmul.msk.f32.vlgmr.msra.gmra.mxu3 %vm229_vm0, %v220_v7  ;;  %p1139_p0 = pneg %p1138_p13 }
  0x20   : > { %p1144_p5 = pnand %p1143_p3, %p1139_p0 }
  0x9a   : > { %v259_v9 = vpop.f32.mrf.mxu0  ;;  %v262_v10 = vpop.f32.mrf.mxu1 }
  0x9b   : > { %v1306_v11 = vadd.f32 %v1303_v8, %v259_v9  ;;  %v1309_v12 = vadd.f32 %v1303_v8, %v262_v10 }
  0x9d   : > { %v271_v13 = vand.u32 2147483647, %v1306_v11  ;;  %v274_v14 = vand.u32 2139095040, %v1306_v11  ;;  %v426_v15 = vand.u32 2147483647, %v1309_v12  ;;  %v429_v16 = vand.u32 2139095040, %v1309_v12 }
  0x9f   : > { %v275_v17 = vshrl.u32 %v274_v14, 23  ;;  %v278_v18 = vand.u32 8388607, %v271_v13  ;;  %v430_v19 = vshrl.u32 %v429_v16, 23  ;;  %v433_v23 = vand.u32 8388607, %v426_v15 }
  0xa1   : > { %v1025_v20 = vadd.s32 4294967169, %v275_v17  ;;  %v279_v21 = vor.u32 8388608, %v278_v18  ;;  %v1028_v22 = vadd.s32 4294967169, %v430_v19  ;;  %v265_v26 = vpop.f32.mrf.mxu2  ;;  %v434_v29 = vor.u32 8388608, %v433_v23 }
  0xa2   : > { %v1326_v34 = vadd.f32 %v1303_v8, %v265_v26 }
  0xa3   : > { %v281_v24 = vadd.s32 1, %v1025_v20  ;;  %v436_v25 = vadd.s32 1, %v1028_v22  ;;  %v1319_v28 = vshll.u32 %v279_v21, 8  ;;  %v1334_v47 = vshll.u32 %v434_v29, 8 }
  0xa4   : > { %v584_v61 = vand.u32 2139095040, %v1326_v34 }
  0xa5   : > { %vm282_vm1 = vcmp.gt.s32.totalorder %v281_v24, 0  ;;  %vm437_vm2 = vcmp.gt.s32.totalorder %v436_v25, 0  ;;  %v320_v46 = vand.u32 65535, %v1319_v28  ;;  %v321_v51 = vshrl.u32 %v1319_v28, 16 }
  0xa6   : > { %v283_v27 = vsel %vm282_vm1, %v281_v24, 0  ;;  %v438_v31 = vsel %vm437_vm2, %v436_v25, 0  ;;  %v1378_v17 = vand.u32 65535, %v1334_v47 }
  0xa7   : > { %v285_v30 = vand.u32 31, %v283_v27  ;;  %v1321_v32 = vshrl.u32 %v283_v27, 5  ;;  %v1323_v33 = vand.u32 31, %v438_v31  ;;  %v1384_v24 = vshrl.u32 %v438_v31, 5 }
  0xa9   : > { %v286_v35 = vsub.s32 32, %v285_v30  ;;  %v288_v37 = vshll.u32 %v1200_v36, %v285_v30  ;;  %v291_v39 = vshll.u32 %v1201_v38, %v285_v30  ;;  %v294_v41 = vshll.u32 %v1202_v40, %v285_v30 }
  0xaa   : > { %v297_v43 = vshll.u32 %v1203_v42, %v285_v30  ;;  %v300_v45 = vshll.u32 %v1204_v44, %v285_v30  ;;  %vm303_vm3 = vcmp.lt.s32.totalorder %v1321_v32, 1  ;;  %vm306_vm4 = vcmp.lt.s32.totalorder %v1321_v32, 4 }
  0xab   : > { %v289_v48 = vshrl.u32 %v1201_v38, %v286_v35  ;;  %v292_v49 = vshrl.u32 %v1202_v40, %v286_v35  ;;  %v295_v50 = vshrl.u32 %v1203_v42, %v286_v35  ;;  %v298_v52 = vshrl.u32 %v1204_v44, %v286_v35 }
  0xac   : > { %v301_v54 = vshrl.u32 %v1205_v53, %v286_v35  ;;  %v1345_v58 = vsub.s32 32, %v1323_v33  ;;  %vm305_vm5 = vcmp.lt.s32.totalorder %v1321_v32, 3  ;;  %v287_v62 = vshrl.u32 %v1200_v36, %v286_v35 }
  0xad   : > { %v290_v55 = vor.u32 %v289_v48, %v288_v37  ;;  %v293_v56 = vor.u32 %v292_v49, %v291_v39  ;;  %v296_v57 = vor.u32 %v295_v50, %v294_v41  ;;  %v299_v59 = vor.u32 %v298_v52, %v297_v43 }
  0xae   : > { %v302_v60 = vor.u32 %v301_v54, %v300_v45  ;;  %vm304_vm6 = vcmp.lt.s32.totalorder %v1321_v32, 2  ;;  %v443_v3 = vshll.u32 %v1200_v36, %v1323_v33  ;;  %v446_v4 = vshll.u32 %v1201_v38, %v1323_v33 }
  0xaf   : > { %v311_v63 = vsel %vm303_vm3, %v290_v55, %v293_v56  ;;  %v315_v0 = vsel %vm303_vm3, %v293_v56, %v296_v57  ;;  %v312_v1 = vsel %vm306_vm4, %v299_v59, 920167782  ;;  %v308_v5 = vsel %vm306_vm4, %v296_v57, 2102212464 }
  0xb0   : > { %v316_v2 = vsel %vm306_vm4, %v302_v60, 1326507024  ;;  %v313_v6 = vsel %vm305_vm5, %v296_v57, %v312_v1  ;;  %v444_v9 = vshrl.u32 %v1201_v38, %v1345_v58  ;;  %v447_v16 = vshrl.u32 %v1202_v40, %v1345_v58 }
  0xb1   : > { %v317_v7 = vsel %vm305_vm5, %v299_v59, %v316_v2  ;;  %v314_v10 = vsel %vm304_vm6, %v311_v63, %v313_v6  ;;  %v307_v22 = vsel %vm303_vm3, %v287_v62, %v290_v55  ;;  %v309_v23 = vsel %vm305_vm5, %v293_v56, %v308_v5 }
  0xb2   : > { %v318_v14 = vsel %vm304_vm6, %v315_v0, %v317_v7  ;;  %v344_v20 = vand.u32 65535, %v314_v10  ;;  %v345_v21 = vshrl.u32 %v314_v10, 16  ;;  %v1386_v25 = vor.u32 %v444_v9, %v443_v3 }
  0xb3   : > { %v322_v18 = vand.u32 65535, %v318_v14  ;;  %v323_v19 = vshrl.u32 %v318_v14, 16  ;;  %v1388_v29 = vor.u32 %v447_v16, %v446_v4  ;;  %v449_v30 = vshll.u32 %v1202_v40, %v1323_v33 }
  0xb4   : > { %v347_v37 = vmul.u32 %v345_v21, %v320_v46  ;;  %v348_v39 = vmul.u32 %v344_v20, %v321_v51  ;;  %v450_v41 = vshrl.u32 %v1203_v42, %v1345_v58  ;;  %v346_v48 = vmul.u32 %v344_v20, %v320_v46 }
  0xb5   : > { %v325_v26 = vmul.u32 %v323_v19, %v320_v46  ;;  %v326_v27 = vmul.u32 %v322_v18, %v321_v51  ;;  %v324_v35 = vmul.u32 %v322_v18, %v320_v46  ;;  %v327_v43 = vmul.u32 %v323_v19, %v321_v51 }
  0xb6   : > { %v349_v31 = vmul.u32 %v345_v21, %v321_v51  ;;  %v350_v54 = vshll.u32 %v347_v37, 16  ;;  %v352_v56 = vshll.u32 %v348_v39, 16  ;;  %v452_v57 = vshll.u32 %v1203_v42, %v1323_v33 }
  0xb7   : > { %v328_v45 = vshll.u32 %v325_v26, 16  ;;  %v329_v49 = vshrl.u32 %v325_v26, 16  ;;  %v330_v50 = vshll.u32 %v326_v27, 16  ;;  %v331_v52 = vshrl.u32 %v326_v27, 16 }
  0xb8   : > { %v1206_v59 = vmov 0   ;;  %vm354_vm8 = vc.u32 %v346_v48, %v350_v54  ;;  %v356_v62 = vadd.s32 %v350_v54, %v346_v48  ;;  %v453_v63 = vshrl.u32 %v1204_v44, %v1345_v58 }
  0xb9   : > { %vm332_vm7 = vc.u32 %v324_v35, %v328_v45  ;;  %v334_v55 = vadd.s32 %v328_v45, %v324_v35  ;;  %v355_v51 = vsel %vm354_vm8, 1, %v1206_v59  ;;  %v455_v0 = vshll.u32 %v1204_v44, %v1323_v33 }
  0xba   : > { %v333_v60 = vsel %vm332_vm7, 1, %v1206_v59  ;;  %v357_v2 = vadd.s32 %v355_v51, %v349_v31  ;;  %vm358_vm10 = vc.u32 %v356_v62, %v352_v56  ;;  %v451_v3 = vor.u32 %v450_v41, %v449_v30 }
  0xbb   : > { %v335_v46 = vadd.s32 %v333_v60, %v327_v43  ;;  %vm336_vm9 = vc.u32 %v334_v55, %v330_v50  ;;  %v359_v5 = vsel %vm358_vm10, 1, %v1206_v59  ;;  %v454_v6 = vor.u32 %v453_v63, %v452_v57 }
  0xbc   : > { %v337_v1 = vsel %vm336_vm9, 1, %v1206_v59  ;;  %v456_v7 = vshrl.u32 %v1205_v53, %v1345_v58  ;;  %v351_v9 = vshrl.u32 %v347_v37, 16  ;;  %v361_v10 = vadd.s32 %v359_v5, %v357_v2 }
  0xbd   : > { %v339_v4 = vadd.s32 %v337_v1, %v335_v46  ;;  %vm458_vm11 = vcmp.lt.s32.totalorder %v1384_v24, 1  ;;  %vm460_vm12 = vcmp.lt.s32.totalorder %v1384_v24, 3  ;;  %v353_v33 = vshrl.u32 %v348_v39, 16 }
  0xbe   : > { %v457_v16 = vor.u32 %v456_v7, %v455_v0  ;;  %vm461_vm13 = vcmp.lt.s32.totalorder %v1384_v24, 4  ;;  %v1409_v18 = vadd.s32 %v356_v62, %v352_v56  ;;  %v362_v19 = vadd.s32 %v361_v10, %v351_v9 }
  0xbf   : > { %v340_v14 = vadd.s32 %v339_v4, %v329_v49  ;;  %v466_v20 = vsel %vm458_vm11, %v1386_v25, %v1388_v29  ;;  %v467_v21 = vsel %vm461_vm13, %v454_v6, 920167782  ;;  %vm459_vm14 = vcmp.lt.s32.totalorder %v1384_v24, 2 }
  0xc0   : > { %v468_v27 = vsel %vm460_vm12, %v451_v3, %v467_v21  ;;  %v470_v30 = vsel %vm458_vm11, %v1388_v29, %v451_v3  ;;  %v310_v35 = vsel %vm304_vm6, %v307_v22, %v309_v23  ;;  %v363_v37 = vadd.s32 %v362_v19, %v353_v33 }
  0xc1   : > { %v1417_v26 = vadd.s32 %v340_v14, %v331_v52  ;;  %v469_v39 = vsel %vm459_vm14, %v466_v20, %v468_v27  ;;  %v471_v41 = vsel %vm461_vm13, %v457_v16, 1326507024  ;;  %v476_v45 = vshrl.u32 %v1334_v47, 16 }
  0xc2   : > { %v472_v43 = vsel %vm460_vm12, %v454_v6, %v471_v41  ;;  %v499_v48 = vand.u32 65535, %v469_v39  ;;  %v367_v31 = vadd.s32 1, %v363_v37  ;;  %v500_v22 = vshrl.u32 %v469_v39, 16 }
  0xc3   : > { %vm366_vm15 = vc.u32 %v1417_v26, %v1409_v18  ;;  %v473_v32 = vsel %vm459_vm14, %v470_v30, %v472_v43  ;;  %v585_v23 = vshrl.u32 %v584_v61, 23  ;;  %v364_v49 = vmul.u32 %v1319_v28, %v310_v35 }
  0xc4   : > { %v477_v50 = vand.u32 65535, %v473_v32  ;;  %v478_v52 = vshrl.u32 %v473_v32, 16  ;;  %v368_v54 = vsel %vm366_vm15, %v367_v31, %v363_v37  ;;  %v442_v55 = vshrl.u32 %v1200_v36, %v1345_v58 }
  0xc5   : > { %v502_v56 = vmul.u32 %v500_v22, %v1378_v17  ;;  %v503_v57 = vmul.u32 %v499_v48, %v476_v45  ;;  %v369_v60 = vadd.s32 %v368_v54, %v364_v49  ;;  %v463_v62 = vsel %vm461_vm13, %v451_v3, 2102212464 }
  0xc6   : > { %v480_v63 = vmul.u32 %v478_v52, %v1378_v17  ;;  %v481_v46 = vmul.u32 %v477_v50, %v476_v45  ;;  %v501_v61 = vmul.u32 %v499_v48, %v1378_v17  ;;  %v504_v51 = vmul.u32 %v500_v22, %v476_v45 }
  0xc7   : > { %v505_v28 = vshll.u32 %v502_v56, 16  ;;  %v1031_v0 = vadd.s32 4294967169, %v585_v23  ;;  %v370_v1 = vadd.s32 536870912, %v369_v60  ;;  %v479_v2 = vmul.u32 %v477_v50, %v1378_v17 }
  0xc8   : > { %v482_v4 = vmul.u32 %v478_v52, %v476_v45  ;;  %v483_v58 = vshll.u32 %v480_v63, 16  ;;  %v485_v5 = vshll.u32 %v481_v46, 16  ;;  %v507_v6 = vshll.u32 %v503_v57, 16 }
  0xc9   : > { %vm509_vm0 = vc.u32 %v501_v61, %v505_v28  ;;  %v511_v7 = vadd.s32 %v505_v28, %v501_v61  ;;  %v371_v9 = vshrl.u32 %v370_v1, 30  ;;  %v581_v16 = vand.u32 2147483647, %v1326_v34 }
  0xca   : > { %vm487_vm1 = vc.u32 %v479_v2, %v483_v58  ;;  %v489_v3 = vadd.s32 %v483_v58, %v479_v2  ;;  %v510_v10 = vsel %vm509_vm0, 1, %v1206_v59  ;;  %v462_v17 = vsel %vm458_vm11, %v442_v55, %v1386_v25 }
  0xcb   : > { %v488_v14 = vsel %vm487_vm1, 1, %v1206_v59  ;;  %v512_v33 = vadd.s32 %v510_v10, %v504_v51  ;;  %vm513_vm2 = vc.u32 %v511_v7, %v507_v6  ;;  %v372_v19 = vshll.u32 %v371_v9, 30 }
  0xcc   : > { %v490_v20 = vadd.s32 %v488_v14, %v482_v4  ;;  %vm491_vm3 = vc.u32 %v489_v3, %v485_v5  ;;  %v464_v21 = vsel %vm460_vm12, %v1388_v29, %v463_v62  ;;  %v514_v30 = vsel %vm513_vm2, 1, %v1206_v59 }
  0xcd   : > { %v492_v27 = vsel %vm491_vm3, 1, %v1206_v59  ;;  %v591_v35 = vadd.s32 1, %v1031_v0  ;;  %v373_v37 = vsub.s32 %v369_v60, %v372_v19  ;;  %v484_v39 = vshrl.u32 %v480_v63, 16 }
  0xce   : > { %v494_v41 = vadd.s32 %v492_v27, %v490_v20  ;;  %v516_v43 = vadd.s32 %v514_v30, %v512_v33  ;;  %vm273_vm4 = vcmp.lt.s32.totalorder %v1306_v11, 0  ;;  %v395_v45 = vsub.s32 4, %v371_v9 }
  0xcf   : > { %v506_v48 = vshrl.u32 %v502_v56, 16  ;;  %vm592_vm5 = vcmp.gt.s32.totalorder %v591_v35, 0  ;;  %vm374_vm6 = vcmp.lt.s32.totalorder %v373_v37, 0  ;;  %v375_v25 = vsub.s32 0, %v373_v37 }
  0xd0   : > { %v486_v31 = vshrl.u32 %v481_v46, 16  ;;  %v495_v32 = vadd.s32 %v494_v41, %v484_v39  ;;  %v465_v29 = vsel %vm459_vm14, %v462_v17, %v464_v21  ;;  %v508_v22 = vshrl.u32 %v503_v57, 16 }
  0xd1   : > { %v517_v23 = vadd.s32 %v516_v43, %v506_v48  ;;  %v593_v49 = vsel %vm592_vm5, %v591_v35, 0  ;;  %v376_v50 = vsel %vm374_vm6, %v375_v25, %v373_v37  ;;  %v1465_v54 = vadd.s32 %v511_v7, %v507_v6 }
  0xd2   : > { %v1463_v52 = vadd.s32 %v495_v32, %v486_v31  ;;  %v588_v55 = vand.u32 8388607, %v581_v16  ;;  %v377_v56 = vclz %v376_v50  ;;  %v396_v60 = vsel %vm273_vm4, %v395_v45, %v371_v9 }
  0xd3   : > { %v518_v62 = vadd.s32 %v517_v23, %v508_v22  ;;  %v595_v63 = vand.u32 31, %v593_v49  ;;  %vm1473_vm7 = vcmp.le.f32.partialorder %v271_v13, 0.7853982  ;;  %v365_v57 = vadd.s32 %v1409_v18, %v1417_v26 }
  0xd4   : > { %v519_v46 = vmul.u32 %v1334_v47, %v465_v29  ;;  %v1026_v61 = vadd.s32 4294967294, %v377_v56  ;;  %vm521_vm8 = vc.u32 %v1463_v52, %v1465_v54  ;;  %v398_v0 = vsel %vm1473_vm7, 0, %v396_v60 }
  0xd5   : > { %v522_v51 = vadd.s32 1, %v518_v62  ;;  %v596_v28 = vsub.s32 32, %v595_v63  ;;  %v589_v1 = vor.u32 8388608, %v588_v55  ;;  %v1484_v2 = vshrl.u32 %v593_v49, 5 }
  0xd6   : > { %v598_v13 = vshll.u32 %v1200_v36, %v595_v63  ;;  %vm1027_vm9 = vcmp.lt.s32.totalorder %v1026_v61, 0  ;;  %v601_v47 = vshll.u32 %v1201_v38, %v595_v63  ;;  %v604_v6 = vshll.u32 %v1202_v40, %v595_v63 }
  0xd7   : > { %v523_v4 = vsel %vm521_vm8, %v522_v51, %v518_v62  ;;  %v599_v18 = vshrl.u32 %v1201_v38, %v596_v28  ;;  %v380_v26 = vsel %vm1027_vm9, 0, %v1026_v61  ;;  %v602_v5 = vshrl.u32 %v1202_v40, %v596_v28 }
  0xd8   : > { %v524_v58 = vadd.s32 %v523_v4, %v519_v46  ;;  %v381_v7 = vsub.s32 32, %v380_v26  ;;  %v385_v9 = vsub.s32 4294967266, %v380_v26  ;;  %v605_v3 = vshrl.u32 %v1203_v42, %v596_v28 }
  0xd9   : > { %v607_v10 = vshll.u32 %v1203_v42, %v595_v63  ;;  %v382_v14 = vshll.u32 %v373_v37, %v380_v26  ;;  %v600_v19 = vor.u32 %v599_v18, %v598_v13  ;;  %v608_v17 = vshrl.u32 %v1204_v44, %v596_v28 }
  0xda   : > { %v525_v33 = vadd.s32 536870912, %v524_v58  ;;  %v383_v20 = vshrl.u32 %v365_v57, %v381_v7  ;;  %v386_v21 = vadd.s32 127, %v385_v9  ;;  %v1494_v27 = vor.u32 %v602_v5, %v601_v47 }
  0xdb   : > { %v611_v30 = vshrl.u32 %v1205_v53, %v596_v28  ;;  %v609_v39 = vor.u32 %v608_v17, %v607_v10  ;;  %v1499_v41 = vshll.u32 %v589_v1, 8  ;;  %v606_v48 = vor.u32 %v605_v3, %v604_v6  ;;  %v268_v1 = vpop.f32.mrf.mxu3 }
  0xdc   : > { %v1497_v35 = vshrl.u32 %v525_v33, 30  ;;  %v384_v43 = vor.u32 %v383_v20, %v382_v14  ;;  %v387_v45 = vshll.u32 %v386_v21, 23  ;;  %v610_v37 = vshll.u32 %v1204_v44, %v595_v63 }
  0xdd   : > { %v415_v25 = vadd.s32 3, %v398_v0  ;;  %vm613_vm10 = vcmp.lt.s32.totalorder %v1484_v2, 1  ;;  %vm616_vm11 = vcmp.lt.s32.totalorder %v1484_v2, 4  ;;  %vm615_vm12 = vcmp.lt.s32.totalorder %v1484_v2, 3 }
  0xde   : > { %v527_v31 = vshll.u32 %v1497_v35, 30  ;;  %v388_v32 = vor.u32 4788187, %v387_v45  ;;  %v612_v29 = vor.u32 %v611_v30, %v610_v37  ;;  %v621_v22 = vsel %vm613_vm10, %v600_v19, %v1494_v27 }
  0xdf   : > { %v622_v49 = vsel %vm616_vm11, %v609_v39, 920167782  ;;  %v630_v50 = vand.u32 65535, %v1499_v41  ;;  %v391_v56 = vcvt.s32.f32 %v384_v43  ;;  %vm614_vm13 = vcmp.lt.s32.totalorder %v1484_v2, 2 }
  0xe0   : > { %v1508_v23 = vsub.s32 %v524_v58, %v527_v31  ;;  %v389_v55 = vand.u32 2147483647, %v388_v32  ;;  %v623_v60 = vsel %vm615_vm12, %v606_v48, %v622_v49  ;;  %v631_v57 = vshrl.u32 %v1499_v41, 16 }
  0xe1   : > { %v624_v63 = vsel %vm614_vm13, %v621_v22, %v623_v60  ;;  %v1522_v61 = vand.u32 3, %v415_v25  ;;  %v625_v51 = vsel %vm613_vm10, %v1494_v27, %v606_v48  ;;  %v626_v0 = vsel %vm616_vm11, %v612_v29, 1326507024 }
  0xe2   : > { %vm529_vm14 = vcmp.lt.s32.totalorder %v1508_v23, 0  ;;  %v530_v62 = vsub.s32 0, %v1508_v23  ;;  %v392_v46 = vmul.f32 %v391_v56, %v389_v55  ;;  %v597_v4 = vshrl.u32 %v1200_v36, %v596_v28 }
  0xe3   : > { %v627_v18 = vsel %vm615_vm12, %v609_v39, %v626_v0  ;;  %v654_v47 = vand.u32 65535, %v624_v63  ;;  %v655_v6 = vshrl.u32 %v624_v63, 16  ;;  %v520_v7 = vadd.s32 %v1465_v54, %v1463_v52 }
  0xe4   : > { %v531_v13 = vsel %vm529_vm14, %v530_v62, %v1508_v23  ;;  %v393_v26 = vxor.u32 2147483648, %v392_v46  ;;  %v628_v5 = vsel %vm614_vm13, %v625_v51, %v627_v18  ;;  %v550_v9 = vsub.s32 4, %v1497_v35 }
  0xe5   : > { %v532_v58 = vclz %v531_v13  ;;  %v632_v3 = vand.u32 65535, %v628_v5  ;;  %v1539_v10 = vadd.f32 %v1303_v8, %v268_v1  ;;  %v1545_v33 = vsel %vm613_vm10, %v597_v4, %v600_v19 }
  0xe6   : > { %v394_v28 = vsel %vm273_vm4, %v393_v26, %v392_v46  ;;  %v633_v17 = vshrl.u32 %v628_v5, 16  ;;  %v1554_v52 = vsel %vm616_vm11, %v606_v48, 2102212464  ;;  %v656_v54 = vmul.u32 %v654_v47, %v630_v50 }
  0xe7   : > { %v1029_v14 = vadd.s32 4294967294, %v532_v58  ;;  %v1550_v20 = vsel %vm1473_vm7, %v1306_v11, %v394_v28  ;;  %v636_v8 = vmul.u32 %v632_v3, %v631_v57  ;;  %v1558_v39 = vmul.u32 %v655_v6, %v630_v50 }
  0xe8   : > { %v399_v21 = vmul.f32 %v1550_v20, %v1550_v20  ;;  %v635_v30 = vmul.u32 %v633_v17, %v630_v50  ;;  %v634_v43 = vmul.u32 %v632_v3, %v630_v50  ;;  %v637_v45 = vmul.u32 %v633_v17, %v631_v57 }
  0xe9   : > { %vm1030_vm15 = vcmp.lt.s32.totalorder %v1029_v14, 0  ;;  %v1560_v37 = vmul.u32 %v654_v47, %v631_v57  ;;  %v640_v32 = vshll.u32 %v636_v8, 16  ;;  %vm428_vm0 = vcmp.lt.s32.totalorder %v1309_v12, 0 }
  0xea   : > { %v535_v19 = vsel %vm1030_vm15, 0, %v1029_v14  ;;  %v400_v24 = vmul.f32 -0.001358992, %v399_v21  ;;  %v407_v25 = vmul.f32 -0.00019511016, %v399_v21  ;;  %v638_v29 = vshll.u32 %v635_v30, 16 }
  0xeb   : > { %v536_v31 = vsub.s32 32, %v535_v19  ;;  %v540_v48 = vsub.s32 4294967266, %v535_v19  ;;  %v641_v22 = vshrl.u32 %v636_v8, 16  ;;  %v659_v49 = vmul.u32 %v655_v6, %v631_v57 }
  0xec   : > { %v401_v55 = vadd.f32 0.041655596, %v400_v24  ;;  %v408_v56 = vadd.f32 0.008332121, %v407_v25  ;;  %v537_v60 = vshll.u32 %v1508_v23, %v535_v19  ;;  %vm642_vm1 = vc.u32 %v634_v43, %v638_v29 }
  0xed   : > { %v538_v62 = vshrl.u32 %v520_v7, %v536_v31  ;;  %v541_v63 = vadd.s32 127, %v540_v48  ;;  %v644_v50 = vadd.s32 %v638_v29, %v634_v43  ;;  %v660_v46 = vshll.u32 %v1558_v39, 16 }
  0xee   : > { %v402_v51 = vmul.f32 %v401_v55, %v399_v21  ;;  %v409_v0 = vmul.f32 %v408_v56, %v399_v21  ;;  %v643_v13 = vsel %vm642_vm1, 1, %v1206_v59  ;;  %vm1568_vm2 = vcmp.le.f32.partialorder %v426_v15, 0.7853982 }
  0xef   : > { %v539_v1 = vor.u32 %v538_v62, %v537_v60  ;;  %v542_v57 = vshll.u32 %v541_v63, 23  ;;  %v639_v18 = vshrl.u32 %v635_v30, 16  ;;  %v645_v23 = vadd.s32 %v643_v13, %v637_v45 }
  0xf0   : > { %vm646_vm3 = vc.u32 %v644_v50, %v640_v32  ;;  %v403_v47 = vadd.f32 -0.4999988, %v402_v51  ;;  %v410_v26 = vadd.f32 -0.16666654, %v409_v0  ;;  %v662_v5 = vshll.u32 %v1560_v37, 16 }
  0xf1   : > { %v647_v58 = vsel %vm646_vm3, 1, %v1206_v59  ;;  %vm418_vm4 = vcmp.eq.s32.totalorder %v1522_v61, 0  ;;  %v543_v6 = vor.u32 4788187, %v542_v57  ;;  %vm664_vm5 = vc.u32 %v656_v54, %v660_v46 }
  0xf2   : > { %v649_v7 = vadd.s32 %v647_v58, %v645_v23  ;;  %v666_v15 = vadd.s32 %v660_v46, %v656_v54  ;;  %v404_v3 = vmul.f32 %v403_v47, %v399_v21  ;;  %v411_v28 = vmul.f32 %v410_v26, %v399_v21 }
  0xf3   : > { %vm417_vm6 = vcmp.lt.s32.totalorder %v1522_v61, 2  ;;  %v546_v14 = vcvt.s32.f32 %v539_v1  ;;  %v665_v17 = vsel %vm664_vm5, 1, %v1206_v59  ;;  %v544_v8 = vand.u32 2147483647, %v543_v6 }
  0xf4   : > { %v650_v30 = vadd.s32 %v649_v7, %v639_v18  ;;  %v667_v19 = vadd.s32 %v665_v17, %v659_v49  ;;  %vm668_vm7 = vc.u32 %v666_v15, %v662_v5  ;;  %v405_v43 = vadd.f32 1.0, %v404_v3 }
  0xf5   : > { %v412_v45 = vadd.f32 1.0, %v411_v28  ;;  %v551_v54 = vsel %vm428_vm0, %v550_v9, %v1497_v35  ;;  %v669_v21 = vsel %vm668_vm7, 1, %v1206_v59  ;;  %v547_v24 = vmul.f32 %v546_v14, %v544_v8 }
  0xf6   : > { %v1584_v25 = vadd.s32 %v650_v30, %v641_v22  ;;  %v661_v31 = vshrl.u32 %v1558_v39, 16  ;;  %v671_v32 = vadd.s32 %v669_v21, %v667_v19  ;;  %v422_v29 = vxor.u32 2147483648, %v405_v43 }
  0xf7   : > { %v413_v48 = vmul.f32 %v412_v45, %v1550_v20  ;;  %v619_v49 = vsel %vm615_vm12, %v1494_v27, %v1554_v52  ;;  %v739_v55 = vand.u32 2139095040, %v1539_v10  ;;  %v548_v35 = vxor.u32 2147483648, %v547_v24 }
  0xf8   : > { %v663_v9 = vshrl.u32 %v1560_v37, 16  ;;  %v1596_v22 = vadd.s32 %v666_v15, %v662_v5  ;;  %v672_v56 = vadd.s32 %v671_v32, %v661_v31  ;;  %vm421_vm8 = vcmp.eq.s32.totalorder %v1522_v61, 2 }
  0xf9   : > { %v419_v39 = vxor.u32 2147483648, %v413_v48  ;;  %v553_v20 = vsel %vm1568_vm2, 0, %v551_v54  ;;  %v740_v60 = vshrl.u32 %v739_v55, 23  ;;  %v549_v27 = vsel %vm428_vm0, %v548_v35, %v547_v24 }
  0xfa   : > { %v620_v52 = vsel %vm614_vm13, %v1545_v33, %v619_v49  ;;  %v673_v62 = vadd.s32 %v672_v56, %v663_v9  ;;  %vm676_vm9 = vc.u32 %v1584_v25, %v1596_v22  ;;  %v423_v63 = vsel %vm421_vm8, %v422_v29, %v413_v48 }
  0xfb   : > { %v420_v37 = vsel %vm418_vm4, %v405_v43, %v419_v39  ;;  %v552_v50 = vsel %vm1568_vm2, %v1309_v12, %v549_v27  ;;  %v1034_v46 = vadd.s32 4294967169, %v740_v60  ;;  %vm414_vm10 = vweird.f32 %v1306_v11 }
  0xfc   : > { %v424_v51 = vsel %vm417_vm6, %v420_v37, %v423_v63  ;;  %v554_v2 = vmul.f32 %v552_v50, %v552_v50  ;;  %v677_v33 = vadd.s32 1, %v673_v62  ;;  %v570_v1 = vadd.s32 3, %v553_v20 }
  0xfd   : > { %v425_v0 = vsel %vm414_vm10, nan, %v424_v51  ;;  %v674_v13 = vmul.u32 %v1499_v41, %v620_v52  ;;  %v746_v57 = vadd.s32 1, %v1034_v46  ;;  %v736_v61 = vand.u32 2147483647, %v1539_v10 }
  0xfe   : > { %891 = vst [vmem:[%s1617_s26] sm:$0xff] %v425_v0  ;;  %v555_v18 = vmul.f32 -0.001358992, %v554_v2  ;;  %v562_v4 = vmul.f32 -0.00019511016, %v554_v2  ;;  %v678_v11 = vsel %vm676_vm9, %v677_v33, %v673_v62  ;;  %v571_v15 = vand.u32 3, %v570_v1 }
  0xff   : > { %v679_v23 = vadd.s32 %v678_v11, %v674_v13  ;;  %vm747_vm11 = vcmp.gt.s32.totalorder %v746_v57, 0  ;;  %v743_v3 = vand.u32 8388607, %v736_v61  ;;  %vm569_vm13 = vweird.f32 %v1309_v12 }
 0x100   : > { %v556_v47 = vadd.f32 0.041655596, %v555_v18  ;;  %v563_v26 = vadd.f32 0.008332121, %v562_v4  ;;  %v748_v58 = vsel %vm747_vm11, %v746_v57, 0  ;;  %vm572_vm12 = vcmp.lt.s32.totalorder %v571_v15, 2 }
 0x101   : > { %v680_v5 = vadd.s32 536870912, %v679_v23  ;;  %v750_v41 = vand.u32 31, %v748_v58  ;;  %v744_v45 = vor.u32 8388608, %v743_v3  ;;  %v1632_v21 = vshrl.u32 %v748_v58, 5 }
 0x102   : > { %v557_v6 = vmul.f32 %v556_v47, %v554_v2  ;;  %v564_v7 = vmul.f32 %v563_v26, %v554_v2  ;;  %vm573_vm15 = vcmp.eq.s32.totalorder %v571_v15, 0  ;;  %vm576_vm0 = vcmp.eq.s32.totalorder %v571_v15, 2 }
 0x103   : > { %v1626_v28 = vshrl.u32 %v680_v5, 30  ;;  %v1628_v14 = vsub.s32 32, %v750_v41  ;;  %v753_v29 = vshll.u32 %v1200_v36, %v750_v41  ;;  %v756_v35 = vshll.u32 %v1201_v38, %v750_v41 }
 0x104   : > { %v558_v17 = vadd.f32 -0.4999988, %v557_v6  ;;  %v565_v8 = vadd.f32 -0.16666654, %v564_v7  ;;  %v759_v20 = vshll.u32 %v1202_v40, %v750_v41  ;;  %v762_v60 = vshll.u32 %v1203_v42, %v750_v41 }
 0x105   : > { %v682_v30 = vshll.u32 %v1626_v28, 30  ;;  %v754_v24 = vshrl.u32 %v1201_v38, %v1628_v14  ;;  %v757_v31 = vshrl.u32 %v1202_v40, %v1628_v14  ;;  %v763_v49 = vshrl.u32 %v1204_v44, %v1628_v14 }
 0x106   : > { %v559_v19 = vmul.f32 %v558_v17, %v554_v2  ;;  %v566_v43 = vmul.f32 %v565_v8, %v554_v2  ;;  %v760_v9 = vshrl.u32 %v1203_v42, %v1628_v14  ;;  %v766_v37 = vshrl.u32 %v1205_v53, %v1628_v14 }
 0x107   : > { %v683_v54 = vsub.s32 %v679_v23, %v682_v30  ;;  %v1646_v52 = vor.u32 %v754_v24, %v753_v29  ;;  %v1648_v62 = vor.u32 %v757_v31, %v756_v35  ;;  %v764_v46 = vor.u32 %v763_v49, %v762_v60 }
 0x108   : > { %v560_v32 = vadd.f32 1.0, %v559_v19  ;;  %v567_v48 = vadd.f32 1.0, %v566_v43  ;;  %v765_v40 = vshll.u32 %v1204_v44, %v750_v41  ;;  %v1655_v51 = vshll.u32 %v744_v45, 8 }
 0x109   : > { %vm684_vm14 = vcmp.lt.s32.totalorder %v683_v54, 0  ;;  %v685_v55 = vsub.s32 0, %v683_v54  ;;  %vm768_vm1 = vcmp.lt.s32.totalorder %v1632_v21, 1  ;;  %vm771_vm2 = vcmp.lt.s32.totalorder %v1632_v21, 4 }
 0x10a   : > { %v568_v56 = vmul.f32 %v567_v48, %v552_v50  ;;  %v577_v39 = vxor.u32 2147483648, %v560_v32  ;;  %v1652_v50 = vor.u32 %v760_v9, %v759_v20  ;;  %v767_v53 = vor.u32 %v766_v37, %v765_v40 }
 0x10b   : > { %v686_v27 = vsel %vm684_vm14, %v685_v55, %v683_v54  ;;  %v776_v1 = vsel %vm768_vm1, %v1646_v52, %v1648_v62  ;;  %vm770_vm4 = vcmp.lt.s32.totalorder %v1632_v21, 3  ;;  %v777_v13 = vsel %vm771_vm2, %v764_v46, 920167782 }
 0x10c   : > { %v574_v63 = vxor.u32 2147483648, %v568_v56  ;;  %v687_v38 = vclz %v686_v27  ;;  %v578_v2 = vsel %vm576_vm0, %v577_v39, %v568_v56  ;;  %v675_v57 = vadd.s32 %v1596_v22, %v1584_v25 }
 0x10d   : > { %vm769_vm5 = vcmp.lt.s32.totalorder %v1632_v21, 2  ;;  %v778_v4 = vsel %vm770_vm4, %v1652_v50, %v777_v13  ;;  %v780_v47 = vsel %vm768_vm1, %v1648_v62, %v1652_v50  ;;  %v781_v25 = vsel %vm771_vm2, %v767_v53, 1326507024 }
 0x10e   : > { %v575_v42 = vsel %vm573_vm15, %v560_v32, %v574_v63  ;;  %v1032_v33 = vadd.s32 4294967294, %v687_v38  ;;  %v779_v23 = vsel %vm769_vm5, %v776_v1, %v778_v4  ;;  %v785_v22 = vand.u32 65535, %v1655_v51 }
 0x10f   : > { %v579_v0 = vsel %vm572_vm12, %v575_v42, %v578_v2  ;;  %v809_v26 = vand.u32 65535, %v779_v23  ;;  %v810_v58 = vshrl.u32 %v779_v23, 16  ;;  %v782_v7 = vsel %vm770_vm4, %v764_v46, %v781_v25 }
 0x110   : > { %v580_v44 = vsel %vm569_vm13, nan, %v579_v0  ;;  %vm1033_vm3 = vcmp.lt.s32.totalorder %v1032_v33, 0  ;;  %v783_v15 = vsel %vm769_vm5, %v780_v47, %v782_v7  ;;  %v786_v3 = vshrl.u32 %v1655_v51, 16 }
 0x111   : > { %892 = vst [vmem:[%s1617_s26 + $0x8] sm:$0xff] %v580_v44  ;;  %v690_v18 = vsel %vm1033_vm3, 0, %v1032_v33  ;;  %v812_v17 = vmul.u32 %v810_v58, %v785_v22  ;;  %v787_v19 = vand.u32 65535, %v783_v15  ;;  %v788_v43 = vshrl.u32 %v783_v15, 16 }
 0x112   : > { %v691_v11 = vsub.s32 32, %v690_v18  ;;  %v695_v12 = vsub.s32 4294967266, %v690_v18  ;;  %v692_v5 = vshll.u32 %v683_v54, %v690_v18  ;;  %v811_v45 = vmul.u32 %v809_v26, %v785_v22 }
 0x113   : > { %v813_v24 = vmul.u32 %v809_v26, %v786_v3  ;;  %v815_v31 = vshll.u32 %v812_v17, 16  ;;  %vm1692_vm6 = vcmp.le.f32.partialorder %v581_v16, 0.7853982  ;;  %vm583_vm7 = vcmp.lt.s32.totalorder %v1326_v34, 0 }
 0x114   : > { %v693_v41 = vshrl.u32 %v675_v57, %v691_v11  ;;  %v696_v6 = vadd.s32 127, %v695_v12  ;;  %v790_v48 = vmul.u32 %v788_v43, %v785_v22  ;;  %v791_v49 = vmul.u32 %v787_v19, %v786_v3 }
 0x115   : > { %v814_v55 = vmul.u32 %v810_v58, %v786_v3  ;;  %vm819_vm8 = vc.u32 %v811_v45, %v815_v31  ;;  %v789_v9 = vmul.u32 %v787_v19, %v785_v22  ;;  %v792_v20 = vmul.u32 %v788_v43, %v786_v3 }
 0x116   : > { %v694_v8 = vor.u32 %v693_v41, %v692_v5  ;;  %v697_v30 = vshll.u32 %v696_v6, 23  ;;  %v793_v56 = vshll.u32 %v790_v48, 16  ;;  %v820_v39 = vsel %vm819_vm8, 1, %v1206_v59 }
 0x117   : > { %v817_v60 = vshll.u32 %v813_v24, 16  ;;  %v821_v27 = vadd.s32 %v815_v31, %v811_v45  ;;  %v822_v16 = vadd.s32 %v820_v39, %v814_v55  ;;  %v795_v63 = vshll.u32 %v791_v49, 16 }
 0x118   : > { %v698_v32 = vor.u32 4788187, %v697_v30  ;;  %v701_v29 = vcvt.s32.f32 %v694_v8  ;;  %vm797_vm9 = vc.u32 %v789_v9, %v793_v56  ;;  %v799_v38 = vadd.s32 %v793_v56, %v789_v9 }
 0x119   : > { %v752_v46 = vshrl.u32 %v1200_v36, %v1628_v14  ;;  %v773_v40 = vsel %vm771_vm2, %v1652_v50, 2102212464  ;;  %v798_v42 = vsel %vm797_vm9, 1, %v1206_v59  ;;  %vm823_vm10 = vc.u32 %v821_v27, %v817_v60 }
 0x11a   : > { %v699_v35 = vand.u32 2147483647, %v698_v32  ;;  %v800_v33 = vadd.s32 %v798_v42, %v792_v20  ;;  %vm801_vm11 = vc.u32 %v799_v38, %v795_v63  ;;  %v824_v0 = vsel %vm823_vm10, 1, %v1206_v59 }
 0x11b   : > { %v772_v53 = vsel %vm768_vm1, %v752_v46, %v1646_v52  ;;  %v802_v1 = vsel %vm801_vm11, 1, %v1206_v59  ;;  %v816_v44 = vshrl.u32 %v812_v17, 16  ;;  %v826_v36 = vadd.s32 %v824_v0, %v822_v16 }
 0x11c   : > { %v702_v37 = vmul.f32 %v701_v29, %v699_v35  ;;  %v774_v50 = vsel %vm770_vm4, %v1648_v62, %v773_v40  ;;  %v794_v13 = vshrl.u32 %v790_v48, 16  ;;  %v804_v57 = vadd.s32 %v802_v1, %v800_v33 }
 0x11d   : > { %v705_v18 = vsub.s32 4, %v1626_v28  ;;  %v818_v52 = vshrl.u32 %v813_v24, 16  ;;  %v827_v11 = vadd.s32 %v826_v36, %v816_v44  ;;  %v796_v12 = vshrl.u32 %v791_v49, 16 }
 0x11e   : > { %v703_v2 = vxor.u32 2147483648, %v702_v37  ;;  %v805_v23 = vadd.s32 %v804_v57, %v794_v13  ;;  %v775_v47 = vsel %vm769_vm5, %v772_v53, %v774_v50  ;;  %v825_v58 = vadd.s32 %v821_v27, %v817_v60 }
 0x11f   : > { %v828_v25 = vadd.s32 %v827_v11, %v818_v52  ;;  %v706_v5 = vsel %vm583_vm7, %v705_v18, %v1626_v28  ;;  %v829_v15 = vmul.u32 %v1655_v51, %v775_v47  ;;  %vm724_vm1 = vweird.f32 %v1326_v34 }
 0x120   : > { %v704_v14 = vsel %vm583_vm7, %v703_v2, %v702_v37  ;;  %v806_v62 = vadd.s32 %v805_v23, %v796_v12  ;;  %v708_v21 = vsel %vm1692_vm6, 0, %v706_v5  ;;  %vm738_vm3 = vcmp.lt.s32.totalorder %v1539_v10, 0 }
 0x121   : > { %v707_v4 = vsel %vm1692_vm6, %v1326_v34, %v704_v14  ;;  %v832_v41 = vadd.s32 1, %v828_v25  ;;  %v725_v24 = vadd.s32 3, %v708_v21  ;;  %vm737_vm4 = vcmp.le.f32.partialorder %v736_v61, 0.7853982 }
 0x122   : > { %v709_v59 = vmul.f32 %v707_v4, %v707_v4  ;;  %vm831_vm12 = vc.u32 %v806_v62, %v825_v58  ;;  %v830_v46 = vadd.s32 %v825_v58, %v806_v62  ;;  %vm879_vm8 = vweird.f32 %v1539_v10 }
 0x123   : > { %v833_v3 = vsel %vm831_vm12, %v832_v41, %v828_v25  ;;  %v726_v55 = vand.u32 3, %v725_v24 }
 0x124   : > { %v710_v22 = vmul.f32 -0.001358992, %v709_v59  ;;  %v717_v26 = vmul.f32 -0.00019511016, %v709_v59  ;;  %v834_v30 = vadd.s32 %v833_v3, %v829_v15 }
 0x125   : > { %vm728_vm14 = vcmp.eq.s32.totalorder %v726_v55, 0  ;;  %vm731_vm15 = vcmp.eq.s32.totalorder %v726_v55, 2  ;;  %vm727_vm0 = vcmp.lt.s32.totalorder %v726_v55, 2 }
 0x126   : > { %v711_v6 = vadd.f32 0.041655596, %v710_v22  ;;  %v718_v7 = vadd.f32 0.008332121, %v717_v26  ;;  %v835_v45 = vadd.s32 536870912, %v834_v30 }
 0x128   : > { %v712_v17 = vmul.f32 %v711_v6, %v709_v59  ;;  %v719_v8 = vmul.f32 %v718_v7, %v709_v59  ;;  %v836_v28 = vshrl.u32 %v835_v45, 30 }
 0x12a   : > { %v713_v19 = vadd.f32 -0.4999988, %v712_v17  ;;  %v720_v43 = vadd.f32 -0.16666654, %v719_v8  ;;  %v837_v49 = vshll.u32 %v836_v28, 30  ;;  %v860_v57 = vsub.s32 4, %v836_v28 }
 0x12c   : > { %v714_v31 = vmul.f32 %v713_v19, %v709_v59  ;;  %v721_v32 = vmul.f32 %v720_v43, %v709_v59  ;;  %v838_v9 = vsub.s32 %v834_v30, %v837_v49  ;;  %v861_v59 = vsel %vm738_vm3, %v860_v57, %v836_v28 }
 0x12d   : > { %v863_v47 = vsel %vm737_vm4, 0, %v861_v59 }
 0x12e   : > { %v715_v48 = vadd.f32 1.0, %v714_v31  ;;  %v722_v29 = vadd.f32 1.0, %v721_v32  ;;  %vm839_vm13 = vcmp.lt.s32.totalorder %v838_v9, 0  ;;  %v840_v56 = vsub.s32 0, %v838_v9 }
 0x12f   : > { %v880_v58 = vadd.s32 3, %v863_v47 }
 0x130   : > { %v723_v51 = vmul.f32 %v722_v29, %v707_v4  ;;  %v732_v35 = vxor.u32 2147483648, %v715_v48  ;;  %v841_v60 = vsel %vm839_vm13, %v840_v56, %v838_v9 }
 0x131   : > { %v842_v16 = vclz %v841_v60  ;;  %v881_v7 = vand.u32 3, %v880_v58 }
 0x132   : > { %v729_v54 = vxor.u32 2147483648, %v723_v51  ;;  %v733_v20 = vsel %vm731_vm15, %v732_v35, %v723_v51 }
 0x133   : > { %v1035_v63 = vadd.s32 4294967294, %v842_v16  ;;  %vm883_vm5 = vcmp.eq.s32.totalorder %v881_v7, 0  ;;  %vm886_vm6 = vcmp.eq.s32.totalorder %v881_v7, 2  ;;  %vm882_vm7 = vcmp.lt.s32.totalorder %v881_v7, 2 }
 0x134   : > { %v730_v39 = vsel %vm728_vm14, %v715_v48, %v729_v54 }
 0x135   : > { %v734_v27 = vsel %vm727_vm0, %v730_v39, %v733_v20  ;;  %vm1036_vm2 = vcmp.lt.s32.totalorder %v1035_v63, 0 }
 0x136   : > { %v735_v37 = vsel %vm724_vm1, nan, %v734_v27  ;;  %v845_v38 = vsel %vm1036_vm2, 0, %v1035_v63 }
 0x137   : > { %893 = vst [vmem:[%s1617_s26 + $0x10] sm:$0xff] %v735_v37  ;;  %v846_v40 = vsub.s32 32, %v845_v38  ;;  %v850_v42 = vsub.s32 4294967266, %v845_v38  ;;  %v847_v2 = vshll.u32 %v838_v9, %v845_v38 }
 0x139   : > { %v848_v33 = vshrl.u32 %v830_v46, %v846_v40  ;;  %v851_v0 = vadd.s32 127, %v850_v42 }
 0x13b   : > { %v849_v53 = vor.u32 %v848_v33, %v847_v2  ;;  %v852_v1 = vshll.u32 %v851_v0, 23 }
 0x13d   : > { %v853_v44 = vor.u32 4788187, %v852_v1  ;;  %v856_v14 = vcvt.s32.f32 %v849_v53 }
 0x13f   : > { %v854_v36 = vand.u32 2147483647, %v853_v44 }
 0x141   : > { %v857_v50 = vmul.f32 %v856_v14, %v854_v36 }
 0x143   : > { %v858_v34 = vxor.u32 2147483648, %v857_v50 }
 0x145   : > { %v859_v13 = vsel %vm738_vm3, %v858_v34, %v857_v50 }
 0x146   : > { %v862_v18 = vsel %vm737_vm4, %v1539_v10, %v859_v13 }
 0x147   : > { %v864_v4 = vmul.f32 %v862_v18, %v862_v18 }
 0x149   : > { %v865_v52 = vmul.f32 -0.001358992, %v864_v4  ;;  %v872_v11 = vmul.f32 -0.00019511016, %v864_v4 }
 0x14b   : > { %v866_v12 = vadd.f32 0.041655596, %v865_v52  ;;  %v873_v23 = vadd.f32 0.008332121, %v872_v11 }
 0x14d   : > { %v867_v25 = vmul.f32 %v866_v12, %v864_v4  ;;  %v874_v22 = vmul.f32 %v873_v23, %v864_v4 }
 0x14f   : > { %v868_v26 = vadd.f32 -0.4999988, %v867_v25  ;;  %v875_v62 = vadd.f32 -0.16666654, %v874_v22 }
 0x151   : > { %v869_v61 = vmul.f32 %v868_v26, %v864_v4  ;;  %v876_v5 = vmul.f32 %v875_v62, %v864_v4 }
 0x153   : > { %v870_v41 = vadd.f32 1.0, %v869_v61  ;;  %v877_v6 = vadd.f32 1.0, %v876_v5 }
 0x155   : > { %v878_v15 = vmul.f32 %v877_v6, %v862_v18  ;;  %v887_v3 = vxor.u32 2147483648, %v870_v41 }
 0x157   : > { %v884_v21 = vxor.u32 2147483648, %v878_v15  ;;  %v888_v8 = vsel %vm886_vm6, %v887_v3, %v878_v15 }
 0x159   : > { %v885_v17 = vsel %vm883_vm5, %v870_v41, %v884_v21 }
 0x15a   : > { %v889_v30 = vsel %vm882_vm7, %v885_v17, %v888_v8 }
 0x15b   : > { %v890_v19 = vsel %vm879_vm8, nan, %v889_v30 }
 0x15c   : > { %894 = vst [vmem:[%s1617_s26 + $0x18] sm:$0xff] %v890_v19 }
 0x15d   : > { %1147 = shalt.err (!%p1144_p5)
}
 0x15e   : > { %s1207_s19 = smov 128   ;;  %s1208_s21 = smov 8  }
 0x15f   : > { %1055 = dma.vmem_to_hbm [thread:$0]  (%p1269_p4), %s910_s4, 512, %s912_s5, %s896_s15, %s1207_s19, %s1207_s19, %s1208_s21  }
 0x160 PF: > { %p1061_p6 = scmp.ge.s32.totalorder %s1198_s17, 2  ;;  %s926_s23 = sand.u32 1, %s1178_s12  }
 0x161   : > { %s927_s26 = scalar_lea.sflag [#allocation3], %s926_s23 }
 0x162   : > { %p1058_p7 = pnand %p1061_p6, %p1276_p8 }
 0x164   : > { %p1059_p9 = pneg %p1058_p7 }
 0x166   : > { %1173 = dma.done.wait (%p1059_p9), %s927_s26, 512  }
 0x167   : > { %1175 = vsyncadd (%p1059_p9), %s927_s26, 4294966784  ;;  %s16_s17 = sadd.s32 1, %s1198_s17   ;;  %s1785_s12 = smov %s1182_s13 }
 0x168   : > { %p13_p10 = scmp.ge.s32.totalorder %s16_s17, 4   ;;  %s1786_s13 = smov %s1186_s14 }
 0x169   : > { %s1787_s14 = smov %s1282_s25  ;;  %s1788_s15 = smov %s1194_s16 }
 0x16a   : > { %s1789_s16 = smov %s1791_s20  ;;  %15 = sbr.rel (!%p13_p10) target bundleno = 4 (0x4), region = 73 }
 0x16f   :  { %933 = vsyncpa [#allocation3], 1 }
 0x170   :  { %935 = vsyncpa [#allocation3 + $0x1], 1 }

</bundles_post_ra>
